<compile_context>
chip_gen: v5e
topology: v5e:2x2
jax: 0.10.0
libtpu: 0.0.40
codegen_flags: <defaults>
</compile_context>

<pallas_src>
import functools

import jax
import jax.numpy as jnp
from jax import lax
from jax.experimental import pallas as pl
from jax.experimental.pallas import tpu as pltpu


# ---------------------------------------------------------------------------
# Kernel
# ---------------------------------------------------------------------------
def _cln_kernel(gain_ref, bias_ref, x_ref, o_ref, *, eps, inv_d):
    # gain_ref : (Bt, 1, D)   precomputed 1 + y@Wg + bg   (f32)
    # bias_ref : (Bt, 1, D)   precomputed     y@Wb + bb   (f32)
    # x_ref    : (Bt, tS, D)  activation tile
    # o_ref    : (Bt, tS, D)
    x = x_ref[...].astype(jnp.float32)                      # (Bt, tS, D)

    # One-pass moments: var = E[x^2] - mean^2 (f32 accumulation, clamped at 0)
    # so the tile-sized operand is traversed once for both reductions instead
    # of the mean -> xc -> var chain re-materializing intermediates in VMEM.
    s1 = jnp.sum(x, axis=-1, keepdims=True)                 # (Bt, tS, 1)
    s2 = jnp.sum(x * x, axis=-1, keepdims=True)             # (Bt, tS, 1)
    mean = s1 * inv_d
    var = jnp.maximum(s2 * inv_d - mean * mean, 0.0)
    inv = lax.rsqrt(var + eps)

    gain = gain_ref[...].astype(jnp.float32)                # (Bt, 1, D) -> bcast
    bias = bias_ref[...].astype(jnp.float32)

    # Fused normalize + conditional affine so intermediates stay in vregs.
    o_ref[...] = ((x - mean) * inv * gain + bias).astype(o_ref.dtype)


# ---------------------------------------------------------------------------
# Per-generation budgets and tile selection
# ---------------------------------------------------------------------------
def _tpu_budgets():
    """(target_block_bytes, vmem_limit_bytes) chosen per TPU generation."""
    try:
        vmem_bytes = int(pltpu.get_tpu_info().vmem_capacity_bytes)
    except Exception:
        vmem_bytes = 64 * 1024 * 1024  # conservative: assume v7x-class
    if vmem_bytes >= 96 * 1024 * 1024:          # v5e / v6e: 128 MiB VMEM
        return 12 * 1024 * 1024, 96 * 1024 * 1024
    return 6 * 1024 * 1024, 48 * 1024 * 1024    # v7x-class: 64 MiB VMEM / TC


def _choose_tiles(B, S, D, itemsize, target_block_bytes):
    """Pick (Bt, tS) for (Bt, tS, D) blocks.

    tS is either a multiple of the dtype sublane count (tail handled by a
    cdiv grid) or the full extent S, so the BlockSpec is always layout-legal.
    Budgeting uses the f32 working-set footprint (in-kernel promotion).
    """
    sublane = (8 * 4) // max(1, itemsize)       # 8 f32, 16 bf16, 32 int8
    work_itemsize = max(itemsize, 4)            # f32 working copies in-kernel
    row_bytes = max(1, D * work_itemsize)
    cap_rows = max(sublane, target_block_bytes // row_bytes)

    if S <= cap_rows:
        tS = S                                   # full extent: always legal
        Bt = max(1, min(B, cap_rows // max(1, S)))
        while B % Bt:                            # keep Bt a divisor of B
            Bt -= 1
        if Bt == B and B > 1:                    # keep >=2 grid steps
            Bt = max(1, B // 2)                  # (v7x dual-TC + pipelining)
            while B % Bt:
                Bt -= 1
    else:
        Bt = 1
        tS = max(sublane, (cap_rows // sublane) * sublane)
        if tS >= S:
            tS = S

    # If the grid still collapsed to a single step, split the sequence axis.
    if (B // Bt) == 1 and pl.cdiv(S, tS) == 1 and S >= 2 * sublane:
        half = -(-((S + 1) // 2) // sublane) * sublane   # round up to sublane
        if half < S:
            tS = half
    return Bt, tS


# ---------------------------------------------------------------------------
# Wrapper
# ---------------------------------------------------------------------------
def precompute_cln_params(wg, bg, wb, bb):
    """Fold both conditioning heads into one (C, 2D) weight + (2D,) bias.

    The '+1' of the gain is folded into the bias term. Do this once per model,
    not per forward call.
    """
    w_cat = jnp.concatenate(
        [wg.astype(jnp.float32), wb.astype(jnp.float32)], axis=1)        # (C, 2D)
    b_cat = jnp.concatenate(
        [bg.astype(jnp.float32) + 1.0, bb.astype(jnp.float32)], axis=0)  # (2D,)
    return w_cat, b_cat


def cln_forward(x, y, w_cat, b_cat, *, eps=1e-5):
    """Conditional LayerNorm forward.

    x     : (B, S, D)  activations (LayerNorm over D = output_size)
    y     : (B, C)     conditioning vector (C = input_size)
    w_cat : (C, 2D)    concat([Wg, Wb], axis=1)   (from precompute_cln_params)
    b_cat : (2D,)      concat([bg + 1, bb])       (from precompute_cln_params)
    """
    B, S, D = x.shape
    assert w_cat.shape[1] == 2 * D and b_cat.shape == (2 * D,)

    # Hoisted conditioning linears: one batched MXU matmul for both heads.
    gb = y.astype(jnp.float32) @ w_cat + b_cat            # (B, 2D)
    gain = gb[:, None, :D]                                # (B, 1, D)
    bias = gb[:, None, D:]                                # (B, 1, D)

    target_block_bytes, vmem_limit_bytes = _tpu_budgets()
    Bt, tS = _choose_tiles(B, S, D, x.dtype.itemsize, target_block_bytes)
    grid = (B // Bt, pl.cdiv(S, tS))

    # TODO(synk): for production shapes where D is not a multiple of 128,
    # pad/pack D to a lane-dense layout (masked variance divisor) to avoid
    # partial vst.msk stores; not done here since it adds full-tensor copies
    # in the wrapper for the small test shape.

    kernel = functools.partial(_cln_kernel, eps=eps, inv_d=1.0 / D)

    return pl.pallas_call(
        kernel,
        out_shape=jax.ShapeDtypeStruct((B, S, D), x.dtype),
        grid_spec=pltpu.PrefetchScalarGridSpec(
            num_scalar_prefetch=0,
            grid=grid,
            in_specs=[
                pl.BlockSpec((Bt, 1, D), lambda b, s: (b, 0, 0)),      # gain
                pl.BlockSpec((Bt, 1, D), lambda b, s: (b, 0, 0)),      # bias
                pl.BlockSpec((Bt, tS, D), lambda b, s: (b, s, 0)),     # x
            ],
            out_specs=pl.BlockSpec((Bt, tS, D), lambda b, s: (b, s, 0)),
        ),
        compiler_params=pltpu.CompilerParams(
            dimension_semantics=("parallel", "parallel"),
            vmem_limit_bytes=vmem_limit_bytes,
        ),
    )(gain, bias, x)


def cln_reference(x, y, wg, bg, wb, bb, *, eps=1e-5):
    """Pure-JAX reference matching the PyTorch forward."""
    gain = 1.0 + (y @ wg + bg)[:, None, :]
    bias = (y @ wb + bb)[:, None, :]
    mean = jnp.mean(x, axis=-1, keepdims=True)
    var = jnp.mean((x - mean) ** 2, axis=-1, keepdims=True)
    normed = (x - mean) / jnp.sqrt(var + eps)
    return normed * gain + bias


if __name__ == "__main__":
    key = jax.random.PRNGKey(0)

    # Small shapes consistent with the module: output_size=D, input_size=C.
    B, S, D, C = 2, 8, 32, 16

    kx, ky, k1, k2, k3, k4 = jax.random.split(key, 6)
    x = jax.random.normal(kx, (B, S, D), dtype=jnp.float32)
    y = jax.random.normal(ky, (B, C), dtype=jnp.float32)

    # Deterministic parameter init (PyTorch-Linear-style uniform bounds).
    bound = 1.0 / jnp.sqrt(jnp.float32(C))
    wg = jax.random.uniform(k1, (C, D), jnp.float32, -bound, bound)
    bg = jax.random.uniform(k2, (D,), jnp.float32, -bound, bound)
    wb = jax.random.uniform(k3, (C, D), jnp.float32, -bound, bound)
    bb = jax.random.uniform(k4, (D,), jnp.float32, -bound, bound)

    # Fold the conditioning weights once (per-model precompute).
    w_cat, b_cat = precompute_cln_params(wg, bg, wb, bb)

    out = cln_forward(x, y, w_cat, b_cat)
    jax.block_until_ready(out)

    ref = cln_reference(x, y, wg, bg, wb, bb)
    assert out.shape == (B, S, D)
    assert jnp.allclose(out, ref, atol=1e-4, rtol=1e-4), "mismatch vs reference"

    print("KERNEL_OK")
</pallas_src>

<mosaic_0001>
module attributes {stable_mosaic.version = 11 : i64} {
  func.func @_cln_kernel(%arg0: i32, %arg1: i32, %arg2: memref<1x1x32xf32, #tpu.memory_space<vmem>>, %arg3: memref<1x1x32xf32, #tpu.memory_space<vmem>>, %arg4: memref<1x8x32xf32, #tpu.memory_space<vmem>>, %arg5: memref<1x8x32xf32, #tpu.memory_space<vmem>>) attributes {dimension_semantics = [#tpu.dimension_semantics<parallel>, #tpu.dimension_semantics<parallel>], iteration_bounds = array<i64: 2, 1>, scalar_prefetch = 0 : i64, scratch_operands = 0 : i64, tpu.core_type = #tpu.core_type<tc>, window_params = [{transform_indices = @transform_0, window_bounds = array<i64: 1, 1, 32>}, {transform_indices = @transform_1, window_bounds = array<i64: 1, 1, 32>}, {transform_indices = @transform_2, window_bounds = array<i64: 1, 8, 32>}, {transform_indices = @transform_3, window_bounds = array<i64: 1, 8, 32>}]} {
    %c0 = arith.constant 0 : index
    %c0_0 = arith.constant 0 : index
    %c0_1 = arith.constant 0 : index
    %0 = vector.load %arg4[%c0, %c0_0, %c0_1] : memref<1x8x32xf32, #tpu.memory_space<vmem>>, vector<1x8x32xf32>
    %cst = arith.constant dense<0.000000e+00> : vector<1x8xf32>
    %1 = vector.multi_reduction <add>, %0, %cst [2] : vector<1x8x32xf32> to vector<1x8xf32>
    %2 = vector.shape_cast %1 : vector<1x8xf32> to vector<1x8x1xf32>
    %3 = arith.mulf %0, %0 : vector<1x8x32xf32>
    %cst_2 = arith.constant dense<0.000000e+00> : vector<1x8xf32>
    %4 = vector.multi_reduction <add>, %3, %cst_2 [2] : vector<1x8x32xf32> to vector<1x8xf32>
    %5 = vector.shape_cast %4 : vector<1x8xf32> to vector<1x8x1xf32>
    %cst_3 = arith.constant 3.125000e-02 : f32
    %6 = vector.broadcast %cst_3 : f32 to vector<1x8x1xf32>
    %7 = arith.mulf %2, %6 : vector<1x8x1xf32>
    %cst_4 = arith.constant 3.125000e-02 : f32
    %8 = vector.broadcast %cst_4 : f32 to vector<1x8x1xf32>
    %9 = arith.mulf %5, %8 : vector<1x8x1xf32>
    %10 = arith.mulf %7, %7 : vector<1x8x1xf32>
    %11 = arith.subf %9, %10 : vector<1x8x1xf32>
    %cst_5 = arith.constant 0.000000e+00 : f32
    %12 = vector.broadcast %cst_5 : f32 to vector<1x8x1xf32>
    %13 = arith.maximumf %11, %12 : vector<1x8x1xf32>
    %cst_6 = arith.constant 9.99999974E-6 : f32
    %14 = vector.broadcast %cst_6 : f32 to vector<1x8x1xf32>
    %15 = arith.addf %13, %14 : vector<1x8x1xf32>
    %16 = math.rsqrt %15 : vector<1x8x1xf32>
    %c0_7 = arith.constant 0 : index
    %c0_8 = arith.constant 0 : index
    %c0_9 = arith.constant 0 : index
    %17 = vector.load %arg2[%c0_7, %c0_8, %c0_9] : memref<1x1x32xf32, #tpu.memory_space<vmem>>, vector<1x1x32xf32>
    %c0_10 = arith.constant 0 : index
    %c0_11 = arith.constant 0 : index
    %c0_12 = arith.constant 0 : index
    %18 = vector.load %arg3[%c0_10, %c0_11, %c0_12] : memref<1x1x32xf32, #tpu.memory_space<vmem>>, vector<1x1x32xf32>
    %19 = vector.broadcast %7 : vector<1x8x1xf32> to vector<1x8x32xf32>
    %20 = arith.subf %0, %19 : vector<1x8x32xf32>
    %21 = vector.broadcast %16 : vector<1x8x1xf32> to vector<1x8x32xf32>
    %22 = arith.mulf %20, %21 : vector<1x8x32xf32>
    %23 = vector.broadcast %17 : vector<1x1x32xf32> to vector<1x8x32xf32>
    %24 = arith.mulf %22, %23 : vector<1x8x32xf32>
    %25 = vector.broadcast %18 : vector<1x1x32xf32> to vector<1x8x32xf32>
    %26 = arith.addf %24, %25 : vector<1x8x32xf32>
    %c0_13 = arith.constant 0 : index
    %c0_14 = arith.constant 0 : index
    %c0_15 = arith.constant 0 : index
    %27 = vector.load %arg5[%c0_13, %c0_14, %c0_15] : memref<1x8x32xf32, #tpu.memory_space<vmem>>, vector<1x8x32xf32>
    tpu.vector_store %arg5[%c0_13, %c0_14, %c0_15], %26 {strides = array<i32>} : memref<1x8x32xf32, #tpu.memory_space<vmem>>, vector<1x8x32xf32>,
    return
  }
  func.func @transform_0(%arg0: i32, %arg1: i32) -> (i32, i32, i32) {
    %c0_i32 = arith.constant 0 : i32
    %c0_i32_0 = arith.constant 0 : i32
    %c0_i32_1 = arith.constant 0 : i32
    return %arg0, %c0_i32, %c0_i32_0 : i32, i32, i32
  }
  func.func @transform_1(%arg0: i32, %arg1: i32) -> (i32, i32, i32) {
    %c0_i32 = arith.constant 0 : i32
    %c0_i32_0 = arith.constant 0 : i32
    %c0_i32_1 = arith.constant 0 : i32
    return %arg0, %c0_i32, %c0_i32_0 : i32, i32, i32
  }
  func.func @transform_2(%arg0: i32, %arg1: i32) -> (i32, i32, i32) {
    %c0_i32 = arith.constant 0 : i32
    %c0_i32_0 = arith.constant 0 : i32
    return %arg0, %arg1, %c0_i32 : i32, i32, i32
  }
  func.func @transform_3(%arg0: i32, %arg1: i32) -> (i32, i32, i32) {
    %c0_i32 = arith.constant 0 : i32
    %c0_i32_0 = arith.constant 0 : i32
    return %arg0, %arg1, %c0_i32 : i32, i32, i32
  }
}

</mosaic_0001>

<bundles_post_ra>
// kernel: tpu_custom_call.1
= control target key start
LH: loop header
LB: loop body
LE: loop exit
PB: predicated region body
PF: predicated region fallthrough
CT: control target
= control target key end

     0   :  { %s896_s0 = inlined_call_operand.hbm [shape: f32[2,1,32], index: 0, kind: input, shape index: {}]   ;;  %s897_s1 = inlined_call_operand.hbm [shape: f32[2,1,32], index: 1, kind: input, shape index: {}]   ;;  %s898_s2 = inlined_call_operand.hbm [shape: f32[2,8,32], index: 2, kind: input, shape index: {}]   ;;  %s899_s3 = inlined_call_operand.hbm [shape: f32[2,8,32], index: 3, kind: output, shape index: {}]  }
   0x1   :  { %902 = sst [smem:[#allocation15_spill]] %s897_s1 }
   0x2   :  { %8 = vsyncpa [#allocation3], 0 }
   0x3   :  { %10 = vsyncpa [#allocation3 + $0x1], 0 }
   0x4   :  { %11 = vsyncpa [#allocation6], 0 }
   0x5   :  { %13 = vsyncpa [#allocation6 + $0x1], 0 }
   0x6   :  { %14 = vsyncpa [#allocation4], 0 }
   0x7   :  { %16 = vsyncpa [#allocation4 + $0x1], 0  ;;  %s729_s12 = smov 0   ;;  %s731_s13 = smov 0  }
   0x8   :  { %s733_s14 = smov 0   ;;  %s735_s15 = smov 0  }
   0x9   :  { %s737_s16 = smov 0   ;;  %s739_s17 = smov 0  }
   0xa LB: > { %903 = sst [smem:[#allocation12_spill]] %s695_s14  ;;  %s760_s18 = sadd.s32 4294967295, %s707_s17   ;;  %s707_s17 = sphi %s739_s17, %s22_s17   ;;  %s703_s16 = sphi %s737_s16, %s919_s16   ;;  %s699_s15 = sphi %s735_s15, %s918_s15   ;;  %s695_s14 = sphi %s733_s14, %s914_s14   ;;  %s691_s13 = sphi %s731_s13, %s917_s13   ;;  %s687_s12 = sphi %s729_s12, %s916_s12  }
   0xb   : > { %s443_s19 = sadd.s32 4294967294, %s707_s17   ;;  %s34_s20 = sadd.s32 1, %s703_s16 }
   0xc   : > { %s41_s21 = sadd.s32 1, %s695_s14  ;;  %p36_p0 = scmp.ge.s32.totalorder %s34_s20, 2 }
   0xd   : > { %p48_p1 = scmp.ne.s32.totalorder %s695_s14, %s691_s13  ;;  %p49_p2 = scmp.eq.s32.totalorder %s707_s17, 0 }
   0xe   : > { %p54_p3 = scmp.ne.s32.totalorder %s691_s13, %s687_s12  ;;  %s921_s20 = smov (%p36_p0, %s34_s20), 0 }
   0xf   : > { %904 = sst [smem:[#allocation13_spill]] %s921_s20  ;;  %p772_p4 = por %p49_p2, %p48_p1 }
  0x10   : > { %p55_p5 = scmp.eq.s32.totalorder %s760_s18, 0  ;;  %s38_s23 = ssub.s32 %s703_s16, %s921_s20 }
  0x11   : > { %p134_p6 = scmp.eq.s32.totalorder %s760_s18, 1  ;;  %p39_p7 = scmp.eq.s32.totalorder %s38_s23, 0 }
  0x12   : > { %p780_p8 = por %p55_p5, %p54_p3  ;;  %p140_p10 = scmp.eq.s32.totalorder %s443_s19, 1 }
  0x13   : > { %p784_p9 = por %p134_p6, %p48_p1  ;;  %p445_p12 = scmp.ge.s32.totalorder %s707_s17, 2 }
  0x14   : > { %s789_s26 = scalar_select %p39_p7, %s695_s14, %s41_s21  }
  0x15   : > { %p791_p11 = por %p140_p10, %p54_p3  ;;  %p477_p13 = scmp.lt.s32.totalorder %s707_s17, 2 }
  0x16   : > { %908 = sst [smem:[#allocation14_spill]] %s789_s26  ;;  %s160_s28 = sand.u32 1, %s695_s14  }
  0x17   : > { %s177_s29 = sand.u32 1, %s707_s17   ;;  %p801_p0 = pnand %p477_p13, %p772_p4 }
  0x18   : > { %s911_s1 = sld [smem:[#allocation15_spill]]  ;;  %s180_s7 = scalar_lea.vmem [#allocation5], %s160_s28 }
  0x19   : > { %s187_s8 = sshll.u32 %s180_s7, 4  ;;  %s178_s10 = scalar_lea.sflag [#allocation6], %s177_s29  ;;  %s188_s8 = int_to_ptr.vmem [resolvable:$true] %s187_s8 }
  0x1a   : > { %p448_p1 = scmp.ge.s32.totalorder %s707_s17, 1  ;;  %p212_p2 = scmp.lt.s32.totalorder %s707_s17, 3 }
  0x1b   : > { %s166_s22 = scalar_lea.hbm %s896_s0, %s703_s16  ;;  %s163_s4 = scalar_lea.vmem [#allocation2], %s160_s28 }
  0x1c   : > { %p813_p3 = pnand %p448_p1, %p212_p2  ;;  %s168_s23 = sshll.u32 %s166_s22, 4  ;;  %s169_s23 = int_to_ptr.hbm [resolvable:$true] %s168_s23 }
  0x1d   : > { %s170_s5 = sshll.u32 %s163_s4, 4  ;;  %s446_s29 = sshll.u32 %s160_s28, 3  ;;  %s171_s5 = int_to_ptr.vmem [resolvable:$true] %s170_s5 }
  0x1e   : > { %s183_s6 = scalar_lea.hbm %s911_s1, %s703_s16  ;;  %s447_s7 = sshll.u32 %s703_s16, 3 }
  0x1f   : > { %s185_s9 = sshll.u32 %s183_s6, 4  ;;  %s161_s6 = scalar_lea.sflag [#allocation3], %s160_s28  ;;  %s186_s9 = int_to_ptr.hbm [resolvable:$true] %s185_s9 }
  0x20   : > { %469 = dma.hbm_to_vmem [thread:$0]  (!%p801_p0), %s186_s9, 16, %s188_s8, %s178_s10  }
  0x21   : > { %466 = dma.hbm_to_vmem [thread:$0]  (!%p801_p0), %s169_s23, 16, %s171_s5, %s161_s6  }
  0x22   : > { %s203_s1 = scalar_lea.hbm %s898_s2, %s447_s7  ;;  %s198_s26 = scalar_lea.vmem [#allocation7], %s446_s29 }
  0x23   : > { %s205_s20 = sshll.u32 %s203_s1, 4  ;;  %s207_s14 = sshll.u32 %s198_s26, 4  ;;  %s206_s20 = int_to_ptr.hbm [resolvable:$true] %s205_s20  ;;  %s208_s14 = int_to_ptr.vmem [resolvable:$true] %s207_s14 }
  0x24   : > { %472 = dma.hbm_to_vmem [thread:$0]  (!%p801_p0), %s206_s20, 128, %s208_s14, %s178_s10  }
  0x25   : > { %216 = sbr.rel (%p813_p3) target bundleno = 209 (0xd1), region = 32  ;;  %s832_s19 = sand.u32 (!%p813_p3), 1, %s691_s13  }
  0x26   : > { %s219_s28 = scalar_lea.sflag (!%p813_p3), [#allocation3], %s832_s19  ;;  %s221_s21 = scalar_lea.vmem (!%p813_p3), [#allocation2], %s832_s19 }
  0x2a   : > { %674 = dma.done.wait (%p780_p8), %s219_s28, 16  }
  0x2b   : > { %676 = vsyncadd (%p780_p8), %s219_s28, 4294967280  ;;  %s227_s1 = sand.u32 1, %s760_s18   ;;  %s230_s20 = scalar_lea.vmem [#allocation5], %s832_s19 }
  0x2c   : > { %s228_s14 = scalar_lea.sflag [#allocation6], %s227_s1 }
  0x2d   : > { %678 = dma.done.wait (%p780_p8), %s228_s14, 144  }
  0x2e   : > { %680 = vsyncadd (%p780_p8), %s228_s14, 4294967152  ;;  %s449_s26 = sshll.u32 %s832_s19, 3  ;;  %vm273_vm0 = vcmask 261120   ;;  %s452_s18 = sshll.u32 %s699_s15, 3  ;;  %v527_v19 = vld [vmem:[%s221_s21] ss:$0 sm:$0xff] }
  0x2f   : > { %s240_s30 = scalar_lea.vmem [#allocation7], %s449_s26  ;;  %s322_s11 = scalar_lea.hbm %s899_s3, %s452_s18  ;;  %v528_v22 = vld [vmem:[%s230_s20] ss:$0 sm:$0xff] }
  0x30   : > { %v272_v0 = vld [vmem:[%s240_s30] sm:$0xff]  ;;  %s271_s22 = scalar_lea.vmem [#allocation8], %s449_s26  ;;  %s326_s15 = sshll.u32 %s322_s11, 4  ;;  %s327_s15 = int_to_ptr.hbm [resolvable:$true] %s326_s15 }
  0x31   : > { %v274_v1 = vsel %vm273_vm0, %v272_v0, 0.0  ;;  %v277_v2 = vmul.f32 %v272_v0, %v272_v0  ;;  %s324_s23 = sshll.u32 %s271_s22, 4  ;;  %s311_s4 = scalar_lea.sflag [#allocation4], %s832_s19  ;;  %s325_s23 = int_to_ptr.vmem [resolvable:$true] %s324_s23 }
  0x32   : > { %275 = vadd.xlane.f32.xlu0 %v274_v1  ;;  %s635_s5 = sshra.s32 %s327_s15, 4  ;;  %s641_s8 = scalar_lea.hbm %s899_s3, 16  ;;  %s636_s5 = int_to_ptr.hbm [resolvable:$true] %s635_s5 }
  0x33   : > { %v278_v3 = vsel %vm273_vm0, %v277_v2, 0.0  ;;  %s637_s6 = scalar_lea.hbm %s636_s5, 8  ;;  %p642_p7 = scmp.lt.s32.totalorder %s636_s5, %s899_s3 }
  0x34   : > { %p638_p4 = scmp.ne.s32.totalorder %s636_s5, %s637_s6  ;;  %p643_p8 = scmp.lt.s32.totalorder %s641_s8, %s637_s6 }
  0x36   : > { %p639_p5 = pnand %p638_p4, %p784_p9  ;;  %p644_p10 = por %p643_p8, %p642_p7 }
  0x38   : > { %p640_p6 = pneg %p639_p5 }
  0x3a   : > { %279 = vadd.xlane.f32.xlu0 %v278_v3  ;;  %p645_p13 = pnand %p644_p10, %p640_p6 }
  0xa5   : > { %v276_v4 = vpop.xlane.xlu0 %275 }
  0xa6   : > { %v281_v5 = vmul.f32 0.03125, %v276_v4 }
  0xa8   : > { %v283_v7 = vmul.f32 %v281_v5, %v281_v5  ;;  %v299_v18 = vsub.f32 %v272_v0, %v281_v5 }
  0xad   : > { %v280_v6 = vpop.xlane.xlu0 %279 }
  0xae   : > { %v282_v8 = vmul.f32 0.03125, %v280_v6 }
  0xb0   : > { %v284_v9 = vsub.f32 %v282_v8, %v283_v7 }
  0xb2   : > { %v285_v10 = vmax.f32 %v284_v9, 0.0 }
  0xb4   : > { %v286_v11 = vadd.f32 1e-05, %v285_v10 }
  0xb6   : > { %529 = vrsqrt.f32 %v286_v11  ;;  %vm293_vm2 = vweird.f32 %v286_v11 }
  0xbc   : > { %v530_v12 = vpop.eup %529 }
  0xbd   : > { %v288_v13 = vmul.f32 %v530_v12, %v286_v11  ;;  %vm294_vm1 = vweird.f32 %v530_v12 }
  0xbe   : > { %vm295_vm3 = vmor %vm293_vm2, %vm294_vm1 }
  0xbf   : > { %v289_v14 = vmul.f32 %v530_v12, %v288_v13 }
  0xc1   : > { %v290_v15 = vmul.f32 0.5, %v289_v14 }
  0xc3   : > { %v291_v16 = vsub.f32 1.5, %v290_v15 }
  0xc5   : > { %v292_v17 = vmul.f32 %v530_v12, %v291_v16 }
  0xc7   : > { %v296_v20 = vsel %vm295_vm3, %v530_v12, %v292_v17 }
  0xc8   : > { %v300_v21 = vmul.f32 %v299_v18, %v296_v20 }
  0xca   : > { %v304_v23 = vmul.f32 %v527_v19, %v300_v21 }
  0xcc   : > { %v308_v24 = vadd.f32 %v528_v22, %v304_v23 }
  0xce   : > { %309 = vst.msk [vmem:[%s271_s22] sm:$0xff] %vm273_vm0, %v308_v24 }
  0xcf   : > { %648 = shalt.err (!%p645_p13)
}
  0xd0   : > { %461 = dma.vmem_to_hbm [thread:$0]  (%p784_p9), %s325_s23, 128, %s327_s15, %s311_s4  }
  0xd1 PF: > { %s338_s19 = sand.u32 1, %s687_s12   ;;  %p474_p0 = pnand %p445_p12, %p791_p11 }
  0xd2   : > { %s339_s21 = scalar_lea.sflag [#allocation4], %s338_s19 }
  0xd3   : > { %p475_p1 = pneg %p474_p0 }
  0xd5   : > { %682 = dma.done.wait (%p475_p1), %s339_s21, 128  }
  0xd6   : > { %684 = vsyncadd (%p475_p1), %s339_s21, 4294967168  ;;  %s22_s17 = sadd.s32 1, %s707_s17   ;;  %s913_s1 = sld [smem:[#allocation12_spill]] }
  0xd7   : > { %p19_p2 = scmp.ge.s32.totalorder %s22_s17, 4   ;;  %s914_s14 = sld [smem:[#allocation14_spill]] }
  0xd8   : > { %s915_s25 = sld [smem:[#allocation13_spill]]  ;;  %s916_s12 = smov %s691_s13 }
  0xd9   : > { %s918_s15 = smov %s703_s16 }
  0xda   :  { %21 = sbr.rel (!%p19_p2) target bundleno = 10 (0xa), region = 101 }
  0xdc   : > { %s917_s13 = smov %s913_s1 }
  0xde   : > { %s919_s16 = smov %s915_s25 }
  0xdf   :  { %345 = vsyncpa [#allocation3], 1 }
  0xe0   :  { %347 = vsyncpa [#allocation3 + $0x1], 1 }
  0xe1   :  { %348 = vsyncpa [#allocation6], 1 }
  0xe2   :  { %350 = vsyncpa [#allocation6 + $0x1], 1 }
  0xe3   :  { %351 = vsyncpa [#allocation4], 1 }
  0xe4   :  { %353 = vsyncpa [#allocation4 + $0x1], 1 }

</bundles_post_ra>
